<compile_context>
chip_gen: v5e
topology: v5e:2x2
jax: 0.10.0
libtpu: 0.0.40
codegen_flags: <defaults>
</compile_context>

<pallas_src>
import functools

import jax
import jax.numpy as jnp
from jax import lax
from jax.experimental import pallas as pl
from jax.experimental.pallas import tpu as pltpu


def greenhouse_kernel(xT_ref, w1_ref, b1_ref, w2_ref, b2_ref, o_ref,
                      *, chunk, n_chunks, unroll):
    # Hoist loop-invariant weights/biases once per tile (JAX doesn't CSE
    # broadcasts inside loops).
    w1 = w1_ref[...]          # (32, 5)   compute dtype
    b1 = b1_ref[...]          # (32, 1)   f32 or bf16 (activation dtype)
    w2 = w2_ref[...]          # (2, 32)   compute dtype
    b2 = b2_ref[...]          # (2, 1)    f32

    def body(c, carry):
        start = pl.multiple_of(c * chunk, chunk)
        xc = xT_ref[:, pl.ds(start, chunk)]                      # (5, chunk)
        # fc1 on the MXU, f32 accumulation. Hidden (32, chunk) stays in vregs.
        h = jnp.dot(w1, xc, preferred_element_type=jnp.float32)
        # Bias + ReLU in the activation dtype (bf16 on the bf16 path, else f32).
        h = jnp.maximum(h.astype(b1.dtype) + b1, 0)
        # fc2 on the MXU; operand narrowed to the weight dtype.
        out = jnp.dot(w2, h.astype(w2.dtype),
                      preferred_element_type=jnp.float32)
        out = out + b2
        # Lane-dense store: chunk is a multiple of 128.
        o_ref[:, pl.ds(start, chunk)] = out.astype(o_ref.dtype)
        return carry

    lax.fori_loop(0, n_chunks, body, 0, unroll=unroll)


def _round_up(n, m):
    return ((n + m - 1) // m) * m


def _tensorcores_per_chip():
    """Best-effort TC-per-chip query (v7x has 2). Falls back to 1."""
    try:
        info = pltpu.get_tpu_info()
        for name in ("num_tensorcores", "tensorcores_per_chip",
                     "num_cores", "cores_per_chip", "core_count"):
            v = getattr(info, name, None)
            if isinstance(v, int) and v > 0:
                return v
    except Exception:
        pass
    return 1


def greenhouse_forward(x, w1, b1, w2, b2, *, tb=16384, chunk=512,
                       compute_dtype=None):
    """Fused GreenhouseNet forward.

    x : (B, 5)
    w1: (32, 5), b1: (32,)   fc1 params in native PyTorch (out, in) layout
    w2: (2, 32), b2: (2,)    fc2 params in native PyTorch layout
    Returns (B, 2) in `compute_dtype` (defaults to x.dtype).
    """
    B, in_dim = x.shape
    hid = w1.shape[0]
    out_dim = w2.shape[0]

    if compute_dtype is None:
        compute_dtype = x.dtype
    compute_dtype = jnp.dtype(compute_dtype)

    # Narrow only at the HBM boundary.
    x = x.astype(compute_dtype)
    w1c = w1.astype(compute_dtype)
    w2c = w2.astype(compute_dtype)
    # Activation dtype for bias+ReLU: bf16 on the bf16 path (VPU-native on
    # v6e/v7x, halves vreg count), f32 otherwise (v5e has no bf16 VALU).
    act_dtype = compute_dtype if compute_dtype == jnp.bfloat16 else jnp.float32
    b1c = b1.astype(act_dtype).reshape(hid, 1)
    b2c = b2.astype(jnp.float32).reshape(out_dim, 1)

    # Batch tile sits on the 128-lane axis -> multiple of 128. Large tiles
    # amortize grid-step overhead; per-tile VMEM is tiny.
    tb = max(128, min(int(tb), _round_up(B, 128)))
    tb = _round_up(tb, 128)
    # v7x: make sure the "parallel" batch axis has >= 2*TC tiles so both
    # TensorCores get work. No-op (returns 1) on v5e/v6e.
    cores = _tensorcores_per_chip()
    if cores > 1:
        tb = max(128, min(tb, _round_up(pl.cdiv(B, 2 * cores), 128)))
    n_tiles = pl.cdiv(B, tb)

    # In-kernel lane-chunk: largest power-of-two divisor of tb, capped at 512,
    # so the (32, chunk) hidden stays register-resident.
    chunk = max(128, min(int(chunk), tb))
    while tb % chunk:
        chunk //= 2
    n_chunks = tb // chunk
    unroll = n_chunks <= 8

    # Lane-dense orientation (batch on the lane axis). Layout plumbing only.
    xT = x.T  # (in_dim, B)

    itemsize = compute_dtype.itemsize
    cost = pl.CostEstimate(
        flops=2 * B * (in_dim * hid + hid * out_dim),
        transcendentals=0,
        bytes_accessed=(B * (in_dim + out_dim) * itemsize
                        + (in_dim * hid + hid * out_dim) * itemsize
                        + (hid + out_dim) * 4),
    )

    kernel = functools.partial(greenhouse_kernel, chunk=chunk,
                               n_chunks=n_chunks, unroll=unroll)

    outT = pl.pallas_call(
        kernel,
        out_shape=jax.ShapeDtypeStruct((out_dim, B), compute_dtype),
        grid=(n_tiles,),
        in_specs=[
            # activations: new batch tile each grid step (ragged last tile OK)
            pl.BlockSpec((in_dim, tb), lambda i: (0, i)),
            # weights / biases: constant block index -> DMA'd once, VMEM-resident
            pl.BlockSpec((hid, in_dim), lambda i: (0, 0)),
            pl.BlockSpec((hid, 1), lambda i: (0, 0)),
            pl.BlockSpec((out_dim, hid), lambda i: (0, 0)),
            pl.BlockSpec((out_dim, 1), lambda i: (0, 0)),
        ],
        out_specs=pl.BlockSpec((out_dim, tb), lambda i: (0, i)),
        compiler_params=pltpu.CompilerParams(
            dimension_semantics=("parallel",)),
        cost_estimate=cost,
    )(xT, w1c, b1c, w2c, b2c)

    # Return in the PyTorch (B, 2) orientation (fuse into consumer if possible).
    return outT.T


def init_params(key):
    """PyTorch-style nn.Linear init, stored in native (out_features, in_features) layout."""
    k1, k2, k3, k4 = jax.random.split(key, 4)
    in1, hid, out = 5, 32, 2
    bound1 = 1.0 / (in1 ** 0.5)
    bound2 = 1.0 / (hid ** 0.5)
    w1 = jax.random.uniform(k1, (hid, in1), jnp.float32, -bound1, bound1)
    b1 = jax.random.uniform(k2, (hid,), jnp.float32, -bound1, bound1)
    w2 = jax.random.uniform(k3, (out, hid), jnp.float32, -bound2, bound2)
    b2 = jax.random.uniform(k4, (out,), jnp.float32, -bound2, bound2)
    return w1, b1, w2, b2


if __name__ == "__main__":
    key = jax.random.PRNGKey(0)
    kx, kp, kx2 = jax.random.split(key, 3)

    w1, b1, w2, b2 = init_params(kp)

    def ref_fn(xx):
        return jnp.maximum(xx @ w1.T + b1, 0.0) @ w2.T + b2

    # 1) Small-batch f32 check (features = 5 per the module).
    batch = 8
    x = jax.random.normal(kx, (batch, 5), jnp.float32)
    out = jax.block_until_ready(greenhouse_forward(x, w1, b1, w2, b2))
    assert out.shape == (batch, 2)
    assert jnp.allclose(out, ref_fn(x), atol=1e-4, rtol=1e-4)

    # 2) Multi-tile grid + ragged final block (exercises pad-free pipelining).
    batch2 = 600
    x2 = jax.random.normal(kx2, (batch2, 5), jnp.float32)
    out2 = jax.block_until_ready(greenhouse_forward(x2, w1, b1, w2, b2, tb=256))
    assert out2.shape == (batch2, 2)
    assert jnp.allclose(out2, ref_fn(x2), atol=1e-4, rtol=1e-4)

    # 3) bf16 path (bf16 hidden/bias/ReLU + bf16 MXU operands, f32 accumulation).
    out3 = jax.block_until_ready(
        greenhouse_forward(x2, w1, b1, w2, b2, tb=256,
                           compute_dtype=jnp.bfloat16))
    assert out3.shape == (batch2, 2)
    assert jnp.allclose(out3.astype(jnp.float32), ref_fn(x2),
                        atol=5e-2, rtol=5e-2)

    print("KERNEL_OK")
</pallas_src>

<mosaic_0001>
module attributes {stable_mosaic.version = 11 : i64} {
  func.func @greenhouse_kernel(%arg0: i32, %arg1: memref<5x128xf32, #tpu.memory_space<vmem>>, %arg2: memref<32x5xf32, #tpu.memory_space<vmem>>, %arg3: memref<32x1xf32, #tpu.memory_space<vmem>>, %arg4: memref<2x32xf32, #tpu.memory_space<vmem>>, %arg5: memref<2x1xf32, #tpu.memory_space<vmem>>, %arg6: memref<2x128xf32, #tpu.memory_space<vmem>>) attributes {dimension_semantics = [#tpu.dimension_semantics<parallel>], iteration_bounds = array<i64: 1>, scalar_prefetch = 0 : i64, scratch_operands = 0 : i64, tpu.core_type = #tpu.core_type<tc>, window_params = [{transform_indices = @transform_0, window_bounds = array<i64: 5, 128>}, {pipeline_mode = #tpu.pipeline_mode<synchronous>, transform_indices = @transform_1, window_bounds = array<i64: 32, 5>}, {pipeline_mode = #tpu.pipeline_mode<synchronous>, transform_indices = @transform_2, window_bounds = array<i64: 32, 1>}, {pipeline_mode = #tpu.pipeline_mode<synchronous>, transform_indices = @transform_3, window_bounds = array<i64: 2, 32>}, {pipeline_mode = #tpu.pipeline_mode<synchronous>, transform_indices = @transform_4, window_bounds = array<i64: 2, 1>}, {transform_indices = @transform_5, window_bounds = array<i64: 2, 128>}]} {
    %c0 = arith.constant 0 : index
    %c0_0 = arith.constant 0 : index
    %0 = vector.load %arg2[%c0, %c0_0] : memref<32x5xf32, #tpu.memory_space<vmem>>, vector<32x5xf32>
    %c0_1 = arith.constant 0 : index
    %c0_2 = arith.constant 0 : index
    %1 = vector.load %arg3[%c0_1, %c0_2] : memref<32x1xf32, #tpu.memory_space<vmem>>, vector<32x1xf32>
    %c0_3 = arith.constant 0 : index
    %c0_4 = arith.constant 0 : index
    %2 = vector.load %arg4[%c0_3, %c0_4] : memref<2x32xf32, #tpu.memory_space<vmem>>, vector<2x32xf32>
    %c0_5 = arith.constant 0 : index
    %c0_6 = arith.constant 0 : index
    %3 = vector.load %arg5[%c0_5, %c0_6] : memref<2x1xf32, #tpu.memory_space<vmem>>, vector<2x1xf32>
    %c0_i32 = arith.constant 0 : i32
    %c128_i32 = arith.constant 128 : i32
    %4 = arith.muli %c0_i32, %c128_i32 : i32
    %5 = tpu.assume_multiple %4, 128 : i32
    %c0_7 = arith.constant 0 : index
    %6 = arith.index_cast %5 : i32 to index
    %7 = vector.load %arg1[%c0_7, %6] : memref<5x128xf32, #tpu.memory_space<vmem>>, vector<5x128xf32>
    %cst = arith.constant dense<0.000000e+00> : vector<32x128xf32>
    %8 = tpu.matmul %0, %7, %cst {dimension_numbers = #tpu.dot_dimension_numbers<[1], [0], [0], [1], [0, 0, 1, 1], [], []>} : vector<32x5xf32>, vector<5x128xf32>, vector<32x128xf32> -> vector<32x128xf32>
    %9 = vector.broadcast %1 : vector<32x1xf32> to vector<32x128xf32>
    %10 = arith.addf %8, %9 : vector<32x128xf32>
    %cst_8 = arith.constant 0.000000e+00 : f32
    %11 = vector.broadcast %cst_8 : f32 to vector<32x128xf32>
    %12 = arith.maximumf %10, %11 : vector<32x128xf32>
    %cst_9 = arith.constant dense<0.000000e+00> : vector<2x128xf32>
    %13 = tpu.matmul %2, %12, %cst_9 {dimension_numbers = #tpu.dot_dimension_numbers<[1], [0], [0], [1], [0, 0, 1, 1], [], []>} : vector<2x32xf32>, vector<32x128xf32>, vector<2x128xf32> -> vector<2x128xf32>
    %14 = vector.broadcast %3 : vector<2x1xf32> to vector<2x128xf32>
    %15 = arith.addf %13, %14 : vector<2x128xf32>
    %c0_10 = arith.constant 0 : index
    %16 = arith.index_cast %5 : i32 to index
    %17 = vector.load %arg6[%c0_10, %16] : memref<2x128xf32, #tpu.memory_space<vmem>>, vector<2x128xf32>
    tpu.vector_store %arg6[%c0_10, %16], %15 {strides = array<i32>} : memref<2x128xf32, #tpu.memory_space<vmem>>, vector<2x128xf32>,
    %c1_i32 = arith.constant 1 : i32
    return
  }
  func.func @transform_0(%arg0: i32) -> (i32, i32) {
    %c0_i32 = arith.constant 0 : i32
    %c0_i32_0 = arith.constant 0 : i32
    return %c0_i32, %arg0 : i32, i32
  }
  func.func @transform_1(%arg0: i32) -> (i32, i32) {
    %c0_i32 = arith.constant 0 : i32
    %c0_i32_0 = arith.constant 0 : i32
    %c0_i32_1 = arith.constant 0 : i32
    return %c0_i32, %c0_i32_0 : i32, i32
  }
  func.func @transform_2(%arg0: i32) -> (i32, i32) {
    %c0_i32 = arith.constant 0 : i32
    %c0_i32_0 = arith.constant 0 : i32
    %c0_i32_1 = arith.constant 0 : i32
    return %c0_i32, %c0_i32_0 : i32, i32
  }
  func.func @transform_3(%arg0: i32) -> (i32, i32) {
    %c0_i32 = arith.constant 0 : i32
    %c0_i32_0 = arith.constant 0 : i32
    %c0_i32_1 = arith.constant 0 : i32
    return %c0_i32, %c0_i32_0 : i32, i32
  }
  func.func @transform_4(%arg0: i32) -> (i32, i32) {
    %c0_i32 = arith.constant 0 : i32
    %c0_i32_0 = arith.constant 0 : i32
    %c0_i32_1 = arith.constant 0 : i32
    return %c0_i32, %c0_i32_0 : i32, i32
  }
  func.func @transform_5(%arg0: i32) -> (i32, i32) {
    %c0_i32 = arith.constant 0 : i32
    %c0_i32_0 = arith.constant 0 : i32
    return %c0_i32, %arg0 : i32, i32
  }
}

</mosaic_0001>

<bundles_post_ra>
// kernel: tpu_custom_call.1
= control target key start
LH: loop header
LB: loop body
LE: loop exit
PB: predicated region body
PF: predicated region fallthrough
CT: control target
= control target key end

     0   :  { %vm65_vm0 = vcmask 1044480   ;;  %vm52_vm1 = vcmask 39936   ;;  %v187_v5 = vmov 0   ;;  %s259_s0 = inlined_call_operand.vmem [shape: f32[5,8], index: 0, kind: input, shape index: {}]   ;;  %s260_s1 = inlined_call_operand.vmem [shape: f32[32,5], index: 1, kind: input, shape index: {}]   ;;  %s261_s2 = inlined_call_operand.vmem [shape: f32[32,1], index: 2, kind: input, shape index: {}]   ;;  %s262_s3 = inlined_call_operand.vmem [shape: f32[2,32], index: 3, kind: input, shape index: {}]   ;;  %s263_s4 = inlined_call_operand.vmem [shape: f32[2,1], index: 4, kind: input, shape index: {}]   ;;  %s264_s5 = inlined_call_operand.hbm [shape: f32[2,8], index: 5, kind: output, shape index: {}]  }
   0x1   :  { %v31_v0 = vld [vmem:[%s259_s0] sm:$0x1f]  ;;  %v22_v1 = vld [vmem:[%s260_s1 + $0x8] sm:$0xff]  ;;  %v24_v2 = vld [vmem:[%s260_s1 + $0x18] sm:$0xff]  ;;  %158 = vset.pattern.permute.xlu0 %v187_v5 }
   0x2   :  { %154 = vmatpush.msk.msra.mxu2 %vm65_vm0, %v31_v0  ;;  %155 = vmatpush.msk.msra.mxu3 %vm65_vm0, %v31_v0  ;;  %v28_v3 = vld [vmem:[%s261_s2 + $0x18] sm:$0xff]  ;;  %v21_v4 = vld [vmem:[%s260_s1] sm:$0xff]  ;;  %v26_v6 = vld [vmem:[%s261_s2 + $0x8] sm:$0xff] }
   0x3   :  { %150 = vmatmul.msk.f32.vlgmr.msra.gmra.mxu2 %vm52_vm1, %v22_v1  ;;  %152 = vmatmul.msk.f32.vlgmr.msra.gmra.mxu3 %vm52_vm1, %v24_v2 }
   0x4   :  { %148 = vmatpush.msk.msra.mxu0 %vm65_vm0, %v31_v0 }
   0x5   :  { %10 = vsyncpa [#allocation3], 0  ;;  %49 = vperm.xlu0 %158, %v28_v3   ;;  %149 = vmatmul.msk.f32.vlgmr.msra.gmra.mxu0 %vm52_vm1, %v21_v4  ;;  %v23_v7 = vld [vmem:[%s260_s1 + $0x10] sm:$0xff]  ;;  %v25_v9 = vld [vmem:[%s261_s2] sm:$0xff]  ;;  %vm107_vm2 = vcmask 261120   ;;  %s139_s15 = sshll.u32 %s264_s5, 4  ;;  %s140_s15 = int_to_ptr.hbm [resolvable:$true] %s139_s15 }
   0x6   :  { %159 = vset.pattern.permute.xlu1 %v187_v5  ;;  %160 = vset.pattern.permute.xlu2 %v187_v5  ;;  %v27_v8 = vld [vmem:[%s261_s2 + $0x10] sm:$0xff]  ;;  %v30_v10 = vld [vmem:[%s263_s4] sm:$0x3]  ;;  %s188_s4 = smov [#allocation2]  }
   0x7   :  { %39 = vperm.xlu1 %159, %v26_v6   ;;  %104 = vperm.xlu2 %160, %v30_v10   ;;  %v29_v27 = vld [vmem:[%s262_s3] sm:$0x3]  ;;  %s137_s12 = sshll.u32 %s188_s4, 4  ;;  %s138_s12 = int_to_ptr.vmem [resolvable:$true] %s137_s12 }
   0xb   :  { %151 = vmatmul.msk.f32.gmra.mxu2 %vm52_vm1, %v23_v7 }
   0xd   :  { %44 = vperm.xlu0 %158, %v27_v8  }
   0xf   :  { %34 = vperm.xlu1 %159, %v25_v9  }
  0x61   :  { %v105_v28 = vpop.permute.xlu2 %104 }
  0x77   :  { %v50_v11 = vpop.permute.xlu0 %49 }
  0x79   :  { %v40_v12 = vpop.permute.xlu1 %39 }
  0x7f   :  { %v45_v17 = vpop.permute.xlu0 %44 }
  0x81   :  { %v35_v18 = vpop.permute.xlu1 %34 }
  0x82   :  { %v86_v19 = vpop.f32.mrf.mxu0 }
  0x83   :  { %v87_v23 = vadd.f32 %v86_v19, %v35_v18 }
  0x85   :  { %v98_v26 = vmax.f32 %v87_v23, 0.0 }
  0x86   :  { %v89_v13 = vpop.f32.mrf.mxu2  ;;  %v95_v14 = vpop.f32.mrf.mxu3 }
  0x87   :  { %v96_v15 = vadd.f32 %v95_v14, %v50_v11  ;;  %v90_v21 = vadd.f32 %v89_v13, %v40_v12 }
  0x89   :  { %v101_v16 = vmax.f32 %v96_v15, 0.0  ;;  %v99_v25 = vmax.f32 %v90_v21, 0.0 }
  0x8b   :  { %123 = vmatpush.msra.mxu1 %v101_v16 }
  0x8e   :  { %v92_v20 = vpop.f32.mrf.mxu2 }
  0x8f   :  { %v93_v22 = vadd.f32 %v92_v20, %v45_v17 }
  0x91   :  { %v100_v24 = vmax.f32 %v93_v22, 0.0 }
  0x93   :  { %124 = vmatpush.msra.mxu1 %v100_v24 }
  0x95   :  { %125 = vmatpush.msra.mxu1 %v99_v25 }
  0x97   :  { %126 = vmatpush.msra.mxu1 %v98_v26 }
  0x98   :  { %153 = vmatmul.msk.f32.vlgmr.msra.gmra.mxu1 %vm107_vm2, %v29_v27 }
 0x115   :  { %v128_v29 = vpop.f32.mrf.mxu1 }
 0x116   :  { %v129_v30 = vadd.f32 %v128_v29, %v105_v28 }
 0x118   :  { %131 = vst [vmem:[#allocation2] sm:$0x3] %v129_v30 }
 0x119   :  { %142 = dma.vmem_to_hbm [thread:$0]  %s138_s12, 32, %s140_s15, [#allocation3]  }
 0x11a   :  { %185 = dma.done.wait [#allocation3], 32  }
 0x11b   :  { %186 = vsyncadd [#allocation3], 4294967264 }
 0x11c   :  { %147 = vsyncpa [#allocation3], 1 }

</bundles_post_ra>
